<compile_context>
chip_gen: v7x
topology: tpu7x:2x2x1
jax: 0.10.0
libtpu: 0.0.40
codegen_flags: <defaults>
</compile_context>

<pallas_src>
import numpy as np
import jax
import jax.numpy as jnp
from jax.experimental import pallas as pl
from jax.experimental.pallas import tpu as pltpu

# db3 decomposition high-pass filter (pywt.Wavelet('db3').filter_bank[1]),
# hard-coded so we do not depend on pywt.  The PyTorch module writes enc_high
# in FORWARD order into conv.weight and nn.Conv1d performs cross-correlation,
# so these taps are applied in forward order as correlation taps (no reversal).
DB3_DEC_HI = (
    -0.3326705529509569,
     0.8068915093133388,
    -0.4598775021193313,
    -0.13501102001039084,
     0.08544127388224149,
     0.035226291882100656,
)
K = len(DB3_DEC_HI)          # 6
PAD = (K - 1) // 2           # 2

# The module never overwrites the Conv1d bias, so it keeps PyTorch's random
# default init.  It is a runtime operand here; this is only a deterministic
# placeholder for the self-test.
# TODO(synk): pass the real exported nn.Conv1d bias value at call time.
_DEFAULT_BIAS = -0.03125

# Lane-padded f32 bytes (input block + output block) per grid step.
_TARGET_STEP_BYTES = 8 * 1024 * 1024


def _round_up(v: int, m: int) -> int:
    return (v + m - 1) // m * m


def _toeplitz(w: int, w_out: int) -> np.ndarray:
    """(W, W_out) banded matrix T with  (x @ T)[j] = sum_k tap[k] * xpad[j+k]."""
    t = np.zeros((w, w_out), np.float32)
    for j in range(w_out):
        for k in range(K):
            i = j + k - PAD          # source column in the un-padded row
            if 0 <= i < w:
                t[i, j] = DB3_DEC_HI[k]
    return t


def _choose_group(rows: int, w: int) -> int:
    """Fold g independent rows into the lane dim so blocks are lane-dense."""
    if w >= 128 or rows <= 1:
        return 1
    desired = min(rows, -(-128 // w))            # ceil(128 / w)
    for g in range(desired, 0, -1):              # largest divisor of rows <= desired
        if rows % g == 0:
            return g
    return 1


def _choose_row_tile(r: int, padded_row_bytes: int) -> int:
    """Large sublane-aligned row tile, budgeted on the lane-padded footprint."""
    tr = max(8, _TARGET_STEP_BYTES // max(padded_row_bytes, 1))
    tr = min(tr, r)
    # Aim for >= 8 grid steps (>= 4 per v7x TensorCore) so the BlockSpec
    # double-buffering can overlap prefetch of i+1 / writeback of i-1 with i.
    if r >= 8 * 64:
        tr = min(tr, -(-r // 8))
    if tr < r:
        tr = max(8, (tr // 8) * 8)               # sublane (8) alignment
    return tr


def _hp_kernel(x_ref, t_ref, bias_ref, o_ref):
    # Cast AFTER the load so narrow input dtypes stream from HBM at full rate.
    x = x_ref[...].astype(jnp.float32)                      # (TR, g*W)
    o_ref[...] = jnp.dot(
        x, t_ref[...],
        preferred_element_type=jnp.float32,
        precision=jax.lax.Precision.HIGHEST,                # full-f32 MXU passes
    ) + bias_ref[0, 0]


def high_pass_filter(x: jax.Array, bias=_DEFAULT_BIAS) -> jax.Array:
    """Pallas equivalent of HighPassFilter.forward for NCHW input."""
    N, C, H, W = x.shape
    w_out = W + 2 * PAD - K + 1                  # = W - 1 for db3
    rows = N * C * H

    # Fold g rows into the lane dim (free, row-major contiguous reshape).
    g = _choose_group(rows, W)
    R = rows // g
    gw_in, gw_out = g * W, g * w_out
    x2d = x.reshape(R, gw_in)

    # Block-diagonal Toeplitz realizing the 6-tap FIR on each folded row.
    # TODO(synk): for very wide W (>~512) switch to a shift-based tap loop /
    # banded matmul; the dense Toeplitz becomes MXU-heavy and T itself large.
    t_bd = jnp.asarray(np.kron(np.eye(g, dtype=np.float32), _toeplitz(W, w_out)))

    bias_arr = jnp.asarray(bias, jnp.float32).reshape(1, 1)

    # Budget blocks against the lane-padded VMEM footprint, not raw bytes.
    pad_in = _round_up(gw_in, 128)
    pad_out = _round_up(gw_out, 128)
    tr = _choose_row_tile(R, 4 * (pad_in + pad_out))
    grid = (pl.cdiv(R, tr),)

    out = pl.pallas_call(
        _hp_kernel,
        out_shape=jax.ShapeDtypeStruct((R, gw_out), jnp.float32),
        grid=grid,
        in_specs=[
            pl.BlockSpec((tr, gw_in), lambda i: (i, 0)),
            pl.BlockSpec((gw_in, gw_out), lambda i: (0, 0)),     # resident, DMA'd once
            pl.BlockSpec(memory_space=pltpu.MemorySpace.SMEM),   # bias scalar
        ],
        out_specs=pl.BlockSpec((tr, gw_out), lambda i: (i, 0)),
        compiler_params=pltpu.CompilerParams(
            dimension_semantics=("parallel",),
            vmem_limit_bytes=32 * 1024 * 1024,   # load-bearing on v5e (16 MiB default)
        ),
    )(x2d, t_bd, bias_arr)

    return out.reshape(N, C, H, w_out)


def _reference(x: np.ndarray, bias: float) -> np.ndarray:
    """Pure-numpy Conv1d cross-correlation reference (PyTorch semantics)."""
    N, C, H, W = x.shape
    rows = N * C * H
    w_out = W + 2 * PAD - K + 1
    xp = np.pad(x.reshape(rows, W).astype(np.float64), ((0, 0), (PAD, PAD)))
    out = np.full((rows, w_out), float(bias), np.float64)
    for k in range(K):
        out += DB3_DEC_HI[k] * xp[:, k:k + w_out]
    return out.reshape(N, C, H, w_out).astype(np.float32)


if __name__ == "__main__":
    key = jax.random.PRNGKey(0)
    N, C, H, W = 2, 4, 16, 16
    x = jax.random.normal(key, (N, C, H, W), dtype=jnp.float32)
    bias = _DEFAULT_BIAS

    y = jax.block_until_ready(high_pass_filter(x, bias))

    ref = _reference(np.asarray(x), bias)
    assert y.shape == (N, C, H, W - 1), y.shape
    np.testing.assert_allclose(np.asarray(y), ref, atol=1e-4, rtol=1e-4)

    print("KERNEL_OK")
</pallas_src>

<mosaic_0001>
module attributes {stable_mosaic.version = 11 : i64} {
  func.func @_hp_kernel(%arg0: i32, %arg1: memref<16x128xf32, #tpu.memory_space<vmem>>, %arg2: memref<128x120xf32, #tpu.memory_space<vmem>>, %arg3: memref<1x1xf32, #tpu.memory_space<smem>>, %arg4: memref<16x120xf32, #tpu.memory_space<vmem>>) attributes {dimension_semantics = [#tpu.dimension_semantics<parallel>], iteration_bounds = array<i64: 1>, scalar_prefetch = 0 : i64, scratch_operands = 0 : i64, tpu.core_type = #tpu.core_type<tc>, window_params = [{transform_indices = @transform_0, window_bounds = array<i64: 16, 128>}, {pipeline_mode = #tpu.pipeline_mode<synchronous>, transform_indices = @transform_1, window_bounds = array<i64: 128, 120>}, {transform_indices = @transform_2, window_bounds = array<i64: 1, 1>}, {transform_indices = @transform_3, window_bounds = array<i64: 16, 120>}]} {
    %c0 = arith.constant 0 : index
    %c0_0 = arith.constant 0 : index
    %0 = vector.load %arg1[%c0, %c0_0] : memref<16x128xf32, #tpu.memory_space<vmem>>, vector<16x128xf32>
    %c0_1 = arith.constant 0 : index
    %c0_2 = arith.constant 0 : index
    %1 = vector.load %arg2[%c0_1, %c0_2] : memref<128x120xf32, #tpu.memory_space<vmem>>, vector<128x120xf32>
    %cst = arith.constant dense<0.000000e+00> : vector<16x120xf32>
    %2 = tpu.matmul %0, %1, %cst {dimension_numbers = #tpu.dot_dimension_numbers<[1], [0], [0], [1], [0, 0, 1, 1], [], []>, precision = #tpu.contract_precision<fp32>} : vector<16x128xf32>, vector<128x120xf32>, vector<16x120xf32> -> vector<16x120xf32>
    %c0_3 = arith.constant 0 : index
    %c0_4 = arith.constant 0 : index
    %3 = memref.load %arg3[%c0_3, %c0_4] : memref<1x1xf32, #tpu.memory_space<smem>>
    %4 = vector.broadcast %3 : f32 to vector<16x120xf32>
    %5 = arith.addf %2, %4 : vector<16x120xf32>
    %c0_5 = arith.constant 0 : index
    %c0_6 = arith.constant 0 : index
    %6 = vector.load %arg4[%c0_5, %c0_6] : memref<16x120xf32, #tpu.memory_space<vmem>>, vector<16x120xf32>
    tpu.vector_store %arg4[%c0_5, %c0_6], %5 {strides = array<i32>} : memref<16x120xf32, #tpu.memory_space<vmem>>, vector<16x120xf32>,
    return
  }
  func.func @transform_0(%arg0: i32) -> (i32, i32) {
    %c0_i32 = arith.constant 0 : i32
    %c0_i32_0 = arith.constant 0 : i32
    return %arg0, %c0_i32 : i32, i32
  }
  func.func @transform_1(%arg0: i32) -> (i32, i32) {
    %c0_i32 = arith.constant 0 : i32
    %c0_i32_0 = arith.constant 0 : i32
    %c0_i32_1 = arith.constant 0 : i32
    return %c0_i32, %c0_i32_0 : i32, i32
  }
  func.func @transform_2(%arg0: i32) -> (i32, i32) {
    %c0_i32 = arith.constant 0 : i32
    %c0_i32_0 = arith.constant 0 : i32
    %c0_i32_1 = arith.constant 0 : i32
    return %c0_i32, %c0_i32_0 : i32, i32
  }
  func.func @transform_3(%arg0: i32) -> (i32, i32) {
    %c0_i32 = arith.constant 0 : i32
    %c0_i32_0 = arith.constant 0 : i32
    return %arg0, %c0_i32 : i32, i32
  }
}

</mosaic_0001>

<bundles_post_ra>
// kernel: tpu_custom_call.1
= control target key start
LH: loop header
LB: loop body
LE: loop exit
PB: predicated region body
PF: predicated region fallthrough
CT: control target
= control target key end

     0   :  { %s1646_s0 = inlined_call_operand.vmem [shape: f32[16,128], index: 0, kind: input, shape index: {}]   ;;  %s1647_s1 = inlined_call_operand.vmem [shape: f32[128,120], index: 1, kind: input, shape index: {}]   ;;  %s1648_s2 = inlined_call_operand.<no memory space> [shape: f32[1,1], index: 2, kind: input, shape index: {}]   ;;  %s1649_s3 = inlined_call_operand.hbm [shape: f32[16,120], index: 3, kind: output, shape index: {}]  }
   0x1   :  { %v18_v0 = vld [vmem:[%s1647_s1] sm:$0xff]  ;;  %v19_v1 = vld [vmem:[%s1647_s1 + $0x8] sm:$0xff]  ;;  %v20_v2 = vld [vmem:[%s1647_s1 + $0x10] sm:$0xff] }
   0x2   :  { %v37_v3 = vand.u32 4294901760, %v18_v0  ;;  %v40_v4 = vand.u32 4294901760, %v19_v1  ;;  %v1323_v5 = vld [vmem:[%s1647_s1 + $0x18] sm:$0xff]  ;;  %v43_v6 = vand.u32 4294901760, %v20_v2  ;;  %v1328_v7 = vld [vmem:[%s1647_s1 + $0x20] sm:$0xff]  ;;  %v1333_v8 = vld [vmem:[%s1647_s1 + $0x28] sm:$0xff] }
   0x3   :  { %v46_v9 = vand.u32 4294901760, %v1323_v5  ;;  %v49_v11 = vand.u32 4294901760, %v1328_v7  ;;  %v52_v12 = vand.u32 4294901760, %v1333_v8  ;;  %v1345_v14 = vld [vmem:[%s1647_s1 + $0x30] sm:$0xff]  ;;  %v1350_v15 = vld [vmem:[%s1647_s1 + $0x38] sm:$0xff]  ;;  %v16_v16 = vld [vmem:[%s1646_s0] sm:$0xff] }
   0x4   :  { %v1336_v10 = vpack.c.bf16 %v40_v4, %v37_v3  ;;  %v1359_v17 = vand.u32 4294901760, %v16_v16 }
   0x5   :  { %v1340_v13 = vpack.c.bf16 %v46_v9, %v43_v6 }
   0x6   :  { %1058 = vmatprep.subr.bf16.mxu1 %v1336_v10  ;;  %1154 = vmatprep.subr.bf16.mxu0 %v1336_v10 }
   0x7   :  { %1060 = vmatpush3.bf16.msra.mxu1 %v1336_v10  ;;  %1156 = vmatpush3.bf16.msra.mxu0 %v1336_v10 }
   0x8   :  { %9 = vsyncpa [#allocation4], 0  ;;  %1062 = vmatprep.subr.bf16.mxu1 %v1340_v13  ;;  %1158 = vmatprep.subr.bf16.mxu0 %v1340_v13  ;;  %v1367_v18 = vpack.c.bf16 %v52_v12, %v49_v11  ;;  %v55_v19 = vand.u32 4294901760, %v1345_v14  ;;  %v58_v20 = vand.u32 4294901760, %v1350_v15  ;;  %v1374_v21 = vld [vmem:[%s1647_s1 + $0x40] sm:$0xff]  ;;  %v1379_v22 = vld [vmem:[%s1647_s1 + $0x48] sm:$0xff]  ;;  %v1382_v23 = vsub.f32 %v16_v16, %v1359_v17 }
   0x9   :  { %v61_v26 = vand.u32 4294901760, %v1374_v21  ;;  %v64_v27 = vand.u32 4294901760, %v1379_v22  ;;  %v1400_v28 = vld [vmem:[%s1647_s1 + $0x50] sm:$0xff]  ;;  %v1405_v29 = vld [vmem:[%s1647_s1 + $0x58] sm:$0xff]  ;;  %v17_v33 = vld [vmem:[%s1646_s0 + $0x8] sm:$0xff]  ;;  %v1433_v38 = vsub.f32 %v18_v0, %v37_v3  ;;  %v1435_v39 = vsub.f32 %v19_v1, %v40_v4  ;;  %s1288_s21 = smov [#allocation3]  }
   0xa   :  { %v119_v24 = vand.u32 4294901760, %v1382_v23  ;;  %v1393_v25 = vpack.c.bf16 %v58_v20, %v55_v19  ;;  %v67_v31 = vand.u32 4294901760, %v1400_v28  ;;  %v70_v35 = vand.u32 4294901760, %v1405_v29  ;;  %v1426_v36 = vld [vmem:[%s1647_s1 + $0x60] sm:$0xff]  ;;  %v1431_v37 = vld [vmem:[%s1647_s1 + $0x68] sm:$0xff]  ;;  %v1446_v43 = vld [vmem:[%s1647_s1 + $0x70] sm:$0xff] }
   0xb   :  { %1064 = vmatpush3.bf16.msra.mxu1 %v1340_v13  ;;  %1160 = vmatpush3.bf16.msra.mxu0 %v1340_v13  ;;  %v1420_v34 = vpack.c.bf16 %v64_v27, %v61_v26  ;;  %v1437_v40 = vand.u32 4294901760, %v17_v33  ;;  %v73_v41 = vand.u32 4294901760, %v1426_v36  ;;  %v76_v42 = vand.u32 4294901760, %v1431_v37  ;;  %v1451_v44 = vld [vmem:[%s1647_s1 + $0x78] sm:$0xff]  ;;  %s728_s22 = sshll.u32 %s1288_s21, 4  ;;  %s729_s22 = int_to_ptr.vmem [resolvable:$true] %s728_s22 }
   0xc   :  { %1066 = vmatprep.subr.bf16.mxu1 %v1367_v18  ;;  %1162 = vmatprep.subr.bf16.mxu0 %v1367_v18  ;;  %v120_v30 = vsub.f32 %v1382_v23, %v119_v24  ;;  %v1453_v45 = vsub.f32 %v20_v2, %v43_v6  ;;  %v1461_v46 = vpack.c.bf16 %v70_v35, %v67_v31  ;;  %v140_v47 = vand.u32 4294901760, %v1433_v38  ;;  %s1264_s23 = scalar_lea.vmem %s729_s22, 256  ;;  %p1269_p1 = scmp.lt.s32.totalorder %s729_s22, %s729_s22 }
   0xd   :  { %984 = vmatprep.mubr.f32.mxu0 %v119_v24  ;;  %v147_v48 = vand.u32 4294901760, %v1435_v39  ;;  %v1466_v49 = vsub.f32 %v1323_v5, %v46_v9  ;;  %v79_v50 = vand.u32 4294901760, %v1446_v43  ;;  %v82_v51 = vand.u32 4294901760, %v1451_v44  ;;  %p1265_p0 = scmp.ne.s32.totalorder %s729_s22, %s1264_s23  ;;  %p1270_p2 = scmp.lt.s32.totalorder %s1264_s23, %s1264_s23 }
   0xe   :  { %v121_v32 = vand.u32 4294901760, %v120_v30  ;;  %v1471_v52 = vsub.f32 %v17_v33, %v1437_v40  ;;  %v1479_v53 = vpack.c.bf16 %v76_v42, %v73_v41  ;;  %v154_v54 = vand.u32 4294901760, %v1453_v45 }
   0xf   :  { %1068 = vmatpush3.bf16.msra.mxu1 %v1367_v18  ;;  %1164 = vmatpush3.bf16.msra.mxu0 %v1367_v18  ;;  %v1485_v55 = vsub.f32 %v1328_v7, %v49_v11  ;;  %v141_v56 = vsub.f32 %v1433_v38, %v140_v47  ;;  %v148_v57 = vsub.f32 %v1435_v39, %v147_v48  ;;  %v161_v58 = vand.u32 4294901760, %v1466_v49  ;;  %p1271_p3 = por %p1270_p2, %p1269_p1 }
  0x10   :  { %1070 = vmatprep.subr.bf16.mxu1 %v1393_v25  ;;  %1166 = vmatprep.subr.bf16.mxu0 %v1393_v25  ;;  %v1495_v59 = vsub.f32 %v1333_v8, %v52_v12  ;;  %v1501_v60 = vpack.c.bf16 %v82_v51, %v79_v50  ;;  %v129_v61 = vand.u32 4294901760, %v1471_v52  ;;  %v155_v62 = vsub.f32 %v1453_v45, %v154_v54 }
  0x11   :  { %879 = vmatprep.mubr.f32.mxu1 %v121_v32  ;;  %v168_v63 = vand.u32 4294901760, %v1485_v55  ;;  %v1511_v0 = vsub.f32 %v1345_v14, %v55_v19  ;;  %v1516_v1 = vsub.f32 %v1350_v15, %v58_v20  ;;  %v142_v2 = vand.u32 4294901760, %v141_v56  ;;  %p1272_p4 = pnand %p1271_p3, %p1265_p0 }
  0x12   :  { %v149_v3 = vand.u32 4294901760, %v148_v57  ;;  %v162_v4 = vsub.f32 %v1466_v49, %v161_v58  ;;  %v175_v5 = vand.u32 4294901760, %v1495_v59  ;;  %v1185_v6 = vpack.c.bf16 %v147_v48, %v140_v47 }
  0x13   :  { %1072 = vmatpush3.bf16.msra.mxu1 %v1393_v25  ;;  %1168 = vmatpush3.bf16.msra.mxu0 %v1393_v25  ;;  %v130_v7 = vsub.f32 %v1471_v52, %v129_v61  ;;  %v1526_v8 = vsub.f32 %v1374_v21, %v61_v26  ;;  %v156_v9 = vand.u32 4294901760, %v155_v62  ;;  %v169_v11 = vsub.f32 %v1485_v55, %v168_v63 }
  0x14   :  { %1074 = vmatprep.subr.bf16.mxu1 %v1420_v34  ;;  %1170 = vmatprep.subr.bf16.mxu0 %v1420_v34  ;;  %v182_v12 = vand.u32 4294901760, %v1511_v0  ;;  %v189_v14 = vand.u32 4294901760, %v1516_v1  ;;  %v1089_v15 = vpack.c.bf16 %v149_v3, %v142_v2  ;;  %v163_v16 = vand.u32 4294901760, %v162_v4 }
  0x15   :  { %v176_v19 = vsub.f32 %v1495_v59, %v175_v5  ;;  %v1539_v20 = vsub.f32 %v1379_v22, %v64_v27  ;;  %v131_v21 = vand.u32 4294901760, %v130_v7  ;;  %v1189_v24 = vpack.c.bf16 %v161_v58, %v154_v54 }
  0x16   :  { %v196_v26 = vand.u32 4294901760, %v1526_v8  ;;  %v1545_v30 = vsub.f32 %v1400_v28, %v67_v31  ;;  %v183_v32 = vsub.f32 %v1511_v0, %v182_v12  ;;  %v190_v33 = vsub.f32 %v1516_v1, %v189_v14 }
  0x17   :  { %1076 = vmatpush3.bf16.msra.mxu1 %v1420_v34  ;;  %1172 = vmatpush3.bf16.msra.mxu0 %v1420_v34  ;;  %v1554_v22 = vsub.f32 %v1405_v29, %v70_v35  ;;  %v1093_v27 = vpack.c.bf16 %v163_v16, %v156_v9  ;;  %v170_v47 = vand.u32 4294901760, %v169_v11  ;;  %v177_v48 = vand.u32 4294901760, %v176_v19 }
  0x18   :  { %1078 = vmatprep.subr.bf16.mxu1 %v1461_v46  ;;  %1174 = vmatprep.subr.bf16.mxu0 %v1461_v46  ;;  %v203_v28 = vand.u32 4294901760, %v1539_v20  ;;  %v1193_v31 = vpack.c.bf16 %v175_v5, %v168_v63  ;;  %v197_v54 = vsub.f32 %v1526_v8, %v196_v26  ;;  %v1561_v56 = vsub.f32 %v1426_v36, %v73_v41 }
  0x19   :  { %v184_v29 = vand.u32 4294901760, %v183_v32  ;;  %v191_v35 = vand.u32 4294901760, %v190_v33  ;;  %v210_v57 = vand.u32 4294901760, %v1545_v30  ;;  %v217_v58 = vand.u32 4294901760, %v1554_v22 }
  0x1a   :  { %v1097_v62 = vpack.c.bf16 %v177_v48, %v170_v47  ;;  %v1569_v63 = vsub.f32 %v1431_v37, %v76_v42  ;;  %v1197_v36 = vpack.c.bf16 %v189_v14, %v182_v12  ;;  %v198_v41 = vand.u32 4294901760, %v197_v54 }
  0x1b   :  { %1080 = vmatpush3.bf16.msra.mxu1 %v1461_v46  ;;  %1176 = vmatpush3.bf16.msra.mxu0 %v1461_v46  ;;  %v1101_v2 = vpack.c.bf16 %v191_v35, %v184_v29  ;;  %v211_v3 = vsub.f32 %v1545_v30, %v210_v57  ;;  %v218_v4 = vsub.f32 %v1554_v22, %v217_v58  ;;  %v224_v5 = vand.u32 4294901760, %v1561_v56 }
  0x1c   :  { %1082 = vmatprep.subr.bf16.mxu1 %v1479_v53  ;;  %1178 = vmatprep.subr.bf16.mxu0 %v1479_v53  ;;  %v231_v37 = vand.u32 4294901760, %v1569_v63  ;;  %v1580_v42 = vsub.f32 %v1446_v43, %v79_v50  ;;  %v1585_v7 = vsub.f32 %v1451_v44, %v82_v51  ;;  %v1201_v9 = vpack.c.bf16 %v203_v28, %v196_v26 }
  0x1d   :  { %v212_v11 = vand.u32 4294901760, %v211_v3  ;;  %v219_v12 = vand.u32 4294901760, %v218_v4  ;;  %v225_v14 = vsub.f32 %v1561_v56, %v224_v5  ;;  %v1205_v51 = vpack.c.bf16 %v217_v58, %v210_v57 }
  0x1e   :  { %v232_v16 = vsub.f32 %v1569_v63, %v231_v37  ;;  %v238_v43 = vand.u32 4294901760, %v1580_v42  ;;  %v245_v50 = vand.u32 4294901760, %v1585_v7  ;;  %v1209_v33 = vpack.c.bf16 %v231_v37, %v224_v5 }
  0x1f   :  { %1084 = vmatpush3.bf16.msra.mxu1 %v1479_v53  ;;  %1180 = vmatpush3.bf16.msra.mxu0 %v1479_v53  ;;  %v1109_v44 = vpack.c.bf16 %v219_v12, %v212_v11  ;;  %v226_v19 = vand.u32 4294901760, %v225_v14  ;;  %v1125_v54 = vpack.c.bf16 %v1466_v49, %v1453_v45  ;;  %vm720_vm0 = vcmask 982016  }
  0x20   :  { %1086 = vmatprep.subr.bf16.mxu1 %v1501_v60  ;;  %1182 = vmatprep.subr.bf16.mxu0 %v1501_v60  ;;  %v246_v26 = vsub.f32 %v1585_v7, %v245_v50 }
  0x22   :  { %v247_v47 = vand.u32 4294901760, %v246_v26 }
  0x23   :  { %1088 = vmatpush3.bf16.msra.mxu1 %v1501_v60  ;;  %1184 = vmatpush3.bf16.msra.mxu0 %v1501_v60 }
  0x24   :  { %1090 = vmatprep.subr.bf16.mxu1 %v1089_v15  ;;  %1186 = vmatprep.subr.bf16.mxu0 %v1185_v6 }
  0x26   :  { %880 = vmatmul.mubr.f32.vlgmr.msra.gmra.mrb[0].mxu1 %v131_v21  ;;  %985 = vmatmul.mubr.f32.vlgmr.msra.gmra.mrb[0].mxu0 %v129_v61  ;;  %v204_v61 = vsub.f32 %v1539_v20, %v203_v28  ;;  %v233_v21 = vand.u32 4294901760, %v232_v16  ;;  %v1213_v28 = vpack.c.bf16 %v245_v50, %v238_v43 }
  0x27   :  { %1092 = vmatpush3.bf16.msra.mxu1 %v1089_v15  ;;  %1188 = vmatpush3.bf16.msra.mxu0 %v1185_v6 }
  0x28   :  { %1094 = vmatprep.subr.bf16.mxu1 %v1093_v27  ;;  %1190 = vmatprep.subr.bf16.mxu0 %v1189_v24  ;;  %v205_v6 = vand.u32 4294901760, %v204_v61  ;;  %v1113_v32 = vpack.c.bf16 %v233_v21, %v226_v19 }
  0x29   :  { %914 = vmatprep.mubr.f32.mxu1 %v1359_v17  ;;  %1019 = vmatprep.mubr.f32.mxu0 %v1359_v17 }
  0x2a   :  { %v1105_v15 = vpack.c.bf16 %v205_v6, %v198_v41 }
  0x2b   :  { %1096 = vmatpush3.bf16.msra.mxu1 %v1093_v27  ;;  %1192 = vmatpush3.bf16.msra.mxu0 %v1189_v24  ;;  %v239_v24 = vsub.f32 %v1580_v42, %v238_v43 }
  0x2c   :  { %1098 = vmatprep.subr.bf16.mxu1 %v1097_v62  ;;  %1194 = vmatprep.subr.bf16.mxu0 %v1193_v31 }
  0x2d   :  { %v240_v27 = vand.u32 4294901760, %v239_v24 }
  0x2f   :  { %1100 = vmatpush3.bf16.msra.mxu1 %v1097_v62  ;;  %1196 = vmatpush3.bf16.msra.mxu0 %v1193_v31  ;;  %v1117_v48 = vpack.c.bf16 %v247_v47, %v240_v27  ;;  %v1121_v31 = vpack.c.bf16 %v1435_v39, %v1433_v38  ;;  %v1129_v38 = vpack.c.bf16 %v1495_v59, %v1485_v55 }
  0x30   :  { %1102 = vmatprep.subr.bf16.mxu1 %v1101_v2  ;;  %1198 = vmatprep.subr.bf16.mxu0 %v1197_v36  ;;  %v1133_v39 = vpack.c.bf16 %v1516_v1, %v1511_v0 }
  0x33   :  { %1104 = vmatpush3.bf16.msra.mxu1 %v1101_v2  ;;  %1200 = vmatpush3.bf16.msra.mxu0 %v1197_v36 }
  0x34   :  { %1106 = vmatprep.subr.bf16.mxu1 %v1105_v15  ;;  %1202 = vmatprep.subr.bf16.mxu0 %v1201_v9 }
  0x37   :  { %1108 = vmatpush3.bf16.msra.mxu1 %v1105_v15  ;;  %1204 = vmatpush3.bf16.msra.mxu0 %v1201_v9 }
  0x38   :  { %1110 = vmatprep.subr.bf16.mxu1 %v1109_v44  ;;  %1206 = vmatprep.subr.bf16.mxu0 %v1205_v51 }
  0x3b   :  { %1112 = vmatpush3.bf16.msra.mxu1 %v1109_v44  ;;  %1208 = vmatpush3.bf16.msra.mxu0 %v1205_v51 }
  0x3c   :  { %1114 = vmatprep.subr.bf16.mxu1 %v1113_v32  ;;  %1210 = vmatprep.subr.bf16.mxu0 %v1209_v33 }
  0x3f   :  { %1116 = vmatpush3.bf16.msra.mxu1 %v1113_v32  ;;  %1212 = vmatpush3.bf16.msra.mxu0 %v1209_v33 }
  0x40   :  { %1118 = vmatprep.subr.bf16.mxu1 %v1117_v48  ;;  %1214 = vmatprep.subr.bf16.mxu0 %v1213_v28 }
  0x43   :  { %1120 = vmatpush3.bf16.msra.mxu1 %v1117_v48  ;;  %1216 = vmatpush3.bf16.msra.mxu0 %v1213_v28 }
  0x44   :  { %1122 = vmatprep.subr.bf16.mxu1 %v1121_v31  ;;  %1218 = vmatprep.subr.bf16.mxu0 %v1336_v10 }
  0x46   :  { %915 = vmatmul.mubr.f32.vlgmr.msra.gmra.mrb[0].mxu1 %v1437_v40  ;;  %1020 = vmatmul.mubr.f32.vlgmr.msra.gmra.mrb[0].mxu0 %v1437_v40 }
  0x47   :  { %1124 = vmatpush3.bf16.msra.mxu1 %v1121_v31  ;;  %1220 = vmatpush3.bf16.msra.mxu0 %v1336_v10  ;;  %v1137_v10 = vpack.c.bf16 %v1539_v20, %v1526_v8 }
  0x48   :  { %1126 = vmatprep.subr.bf16.mxu1 %v1125_v54  ;;  %1222 = vmatprep.subr.bf16.mxu0 %v1340_v13 }
  0x49   :  { %949 = vmatprep.mubr.f32.mxu1 %v1382_v23  ;;  %1054 = vmatprep.mubr.f32.mxu0 %v1359_v17  ;;  %v1145_v17 = vpack.c.bf16 %v1569_v63, %v1561_v56  ;;  %v35_v23 = vstv %s1648_s2 }
  0x4b   :  { %1128 = vmatpush3.bf16.msra.mxu1 %v1125_v54  ;;  %1224 = vmatpush3.bf16.msra.mxu0 %v1340_v13  ;;  %v1141_v13 = vpack.c.bf16 %v1554_v22, %v1545_v30 }
  0x4c   :  { %1130 = vmatprep.subr.bf16.mxu1 %v1129_v38  ;;  %1226 = vmatprep.subr.bf16.mxu0 %v1367_v18 }
  0x4f   :  { %1132 = vmatpush3.bf16.msra.mxu1 %v1129_v38  ;;  %1228 = vmatpush3.bf16.msra.mxu0 %v1367_v18  ;;  %v1149_v18 = vpack.c.bf16 %v1585_v7, %v1580_v42 }
  0x50   :  { %1134 = vmatprep.subr.bf16.mxu1 %v1133_v39  ;;  %1230 = vmatprep.subr.bf16.mxu0 %v1393_v25 }
  0x53   :  { %1136 = vmatpush3.bf16.msra.mxu1 %v1133_v39  ;;  %1232 = vmatpush3.bf16.msra.mxu0 %v1393_v25 }
  0x54   :  { %1138 = vmatprep.subr.bf16.mxu1 %v1137_v10  ;;  %1234 = vmatprep.subr.bf16.mxu0 %v1420_v34 }
  0x57   :  { %1140 = vmatpush3.bf16.msra.mxu1 %v1137_v10  ;;  %1236 = vmatpush3.bf16.msra.mxu0 %v1420_v34 }
  0x58   :  { %1142 = vmatprep.subr.bf16.mxu1 %v1141_v13  ;;  %1238 = vmatprep.subr.bf16.mxu0 %v1461_v46 }
  0x5b   :  { %1144 = vmatpush3.bf16.msra.mxu1 %v1141_v13  ;;  %1240 = vmatpush3.bf16.msra.mxu0 %v1461_v46 }
  0x5c   :  { %1146 = vmatprep.subr.bf16.mxu1 %v1145_v17  ;;  %1242 = vmatprep.subr.bf16.mxu0 %v1479_v53 }
  0x5f   :  { %1148 = vmatpush3.bf16.msra.mxu1 %v1145_v17  ;;  %1244 = vmatpush3.bf16.msra.mxu0 %v1479_v53 }
  0x60   :  { %1150 = vmatprep.subr.bf16.mxu1 %v1149_v18  ;;  %1246 = vmatprep.subr.bf16.mxu0 %v1501_v60 }
  0x63   :  { %1152 = vmatpush3.bf16.msra.mxu1 %v1149_v18  ;;  %1248 = vmatpush3.bf16.msra.mxu0 %v1501_v60 }
  0x66   :  { %950 = vmatmul.mubr.f32.vlgmr.msra.gmra.mrb[0].mxu1 %v1471_v52  ;;  %1055 = vmatmul.mubr.f32.vlgmr.msra.gmra.mrb[0].mxu0 %v1437_v40 }
 0x139   :  { %v951_v25 = vpop.f32.mrb[0].mxu1  ;;  %v1056_v34 = vpop.f32.mrb[0].mxu0 }
 0x13a   :  { %v1249_v45 = vadd.f32 %v951_v25, %v35_v23  ;;  %v394_v46 = vpop.f32.mrb[1].mxu1  ;;  %v710_v49 = vpop.f32.mrb[1].mxu0 }
 0x13b   :  { %v1251_v53 = vadd.f32 %v394_v46, %v35_v23 }
 0x13c   :  { %v1250_v55 = vadd.f32 %v1249_v45, %v1056_v34 }
 0x13d   :  { %v1252_v59 = vadd.f32 %v1251_v53, %v710_v49 }
 0x13e   :  { %722 = vst.msk [vmem:[#allocation3 + $0x8] sm:$0xff] %vm720_vm0, %v1250_v55 }
 0x13f   :  { %721 = vst.msk [vmem:[#allocation3] sm:$0xff] %vm720_vm0, %v1252_v59 }
 0x140   :  { %1275 = shalt.err (!%p1272_p4)
}
 0x141   :  { %s1276_s25 = scalar_lea.hbm %s1649_s3, 256 }
 0x142   :  { %p1277_p5 = scmp.ne.s32.totalorder %s1649_s3, %s1276_s25  ;;  %p1280_p6 = scmp.lt.u32.totalorder %s1276_s25, %s1649_s3 }
 0x144   :  { %p1282_p7 = pnand %p1280_p6, %p1277_p5 }
 0x146   :  { %1285 = shalt.err (!%p1282_p7)
}
 0x147   :  { %s1289_s30 = smov 128   ;;  %s1290_s4 = smov 8  }
 0x148   :  { %734 = dma.vmem_to_hbm [thread:$0]  %s729_s22, 256, %s1649_s3, [#allocation4], %s1289_s30, %s1289_s30, %s1290_s4  }
 0x149   :  { %1286 = dma.done.wait [#allocation4], 256  }
 0x14a   :  { %1287 = vsyncadd [#allocation4], 4294967040 }
 0x14b   :  { %738 = vsyncpa [#allocation4], 1 }

</bundles_post_ra>
